<compile_context>
chip_gen: v7x
topology: tpu7x:2x2x1
jax: 0.10.0
libtpu: 0.0.40
codegen_flags: <defaults>
</compile_context>

<pallas_src>
import functools
import math

import jax
import jax.numpy as jnp
from jax import lax
from jax.experimental import pallas as pl
from jax.experimental.pallas import tpu as pltpu


_VMEM_LIMIT = 64 * 1024 * 1024            # scoped VMEM cap for the layer kernels
_RHS_RESIDENT_MAX_BYTES = 16 * 1024 * 1024  # budget for a fully VMEM-resident RHS (x2 bufs)


def _round_up(x, m):
    return ((x + m - 1) // m) * m


def _choose_tiles(n, tm_pref, tk_pref):
    """Pick (tm, tk, padded_n).

    tm: multiple of 8, shrunk until the 'parallel' row axis has >= 2 tiles
        (v7x megacore) whenever the graph allows it.
    tk: multiple of 128 (lane dim of the streamed A tile).
    padded_n: multiple of both, so every grid divides exactly (no full-dim fallback).
    """
    tm = _round_up(max(8, min(tm_pref, _round_up(n, 8))), 8)
    while tm > 8 and _round_up(n, tm) // tm < 2:
        tm = _round_up(max(8, tm // 2), 8)
    tk = _round_up(max(128, min(tk_pref, _round_up(n, 128))), 128)
    n_pad = _round_up(n, math.lcm(tm, tk))
    return tm, tk, n_pad


# ---------------------------------------------------------------------------
# Kernel 1: row-tiled projection  XW = X @ [W1_low | 0 | W1_high | 0]  (bf16)
# ---------------------------------------------------------------------------
def _project_kernel(x_ref, w_ref, o_ref):
    o_ref[...] = jnp.dot(x_ref[...], w_ref[...],
                         preferred_element_type=jnp.float32).astype(o_ref.dtype)


def project(x_bf, w1_bf, *, tm):
    n_pad, d = x_bf.shape
    f = w1_bf.shape[1]
    return pl.pallas_call(
        _project_kernel,
        out_shape=jax.ShapeDtypeStruct((n_pad, f), jnp.bfloat16),
        grid=(n_pad // tm,),
        in_specs=[pl.BlockSpec((tm, d), lambda i: (i, 0)),
                  pl.BlockSpec((d, f), lambda i: (0, 0))],       # weight resident
        out_specs=pl.BlockSpec((tm, f), lambda i: (i, 0)),
        compiler_params=pltpu.CompilerParams(
            dimension_semantics=("parallel",),
            vmem_limit_bytes=_VMEM_LIMIT),
    )(x_bf, w1_bf)


# ---------------------------------------------------------------------------
# Kernel 2: layer 1 (both branches) in one streamed pass over A.
#   T  = a_scale * (A @ XW)                 (A streamed bf16/int8/fp8, f32 acc)
#   H1 = relu(m_branch_row * T)             (row mask moved off A)
#   G  = (m_branch_row * H1) @ blockdiag(W2_low, W2_high)   (bf16 epilogue matmul)
# ---------------------------------------------------------------------------
def _layer1_kernel(a_ref, xw_ref, m_ref, w2_ref, g_ref, acc_ref, *,
                   hid_p, tk, rhs_resident, a_scale):
    k = pl.program_id(1)

    @pl.when(k == 0)
    def _():
        acc_ref[...] = jnp.zeros_like(acc_ref)

    a = a_ref[...]
    if a.dtype != jnp.bfloat16:               # int8 / fp8 stream -> dequant in VMEM
        a = a.astype(jnp.bfloat16)
    if rhs_resident:
        start = pl.multiple_of(k * tk, tk)
        xw = xw_ref[pl.ds(start, tk), :]
    else:
        xw = xw_ref[...]
    acc_ref[...] += jnp.dot(a, xw, preferred_element_type=jnp.float32)

    @pl.when(k == pl.num_programs(1) - 1)
    def _():
        t = acc_ref[...]                                   # [tm, f] f32
        if a_scale != 1.0:
            t = t * a_scale
        # First hid_p lanes = "low" branch, remaining lanes = "high" branch.
        lane = lax.broadcasted_iota(jnp.int32, t.shape, 1)
        m_both = m_ref[...]                                # [tm, 2] packed masks
        m = jnp.where(lane < hid_p, m_both[:, 0:1], m_both[:, 1:2])
        h1 = jnp.maximum(m * t, 0.0)       # row-masked propagation + ReLU
        # TODO(synk): training-mode dropout (do_low / do_high) would apply here.
        hm = (m * h1).astype(jnp.bfloat16)  # layer-2 column mask moved onto H
        g = jnp.dot(hm, w2_ref[...], preferred_element_type=jnp.float32)
        g_ref[...] = g.astype(g_ref.dtype)


def layer1(a, xw_bf, m2, w2_bf, *, tm, tk, hid_p, a_scale, rhs_resident):
    n_pad = a.shape[0]
    f = xw_bf.shape[1]
    kernel = functools.partial(_layer1_kernel, hid_p=hid_p, tk=tk,
                               rhs_resident=rhs_resident, a_scale=a_scale)
    xw_spec = (pl.BlockSpec((n_pad, f), lambda i, k: (0, 0)) if rhs_resident
               else pl.BlockSpec((tk, f), lambda i, k: (k, 0)))
    return pl.pallas_call(
        kernel,
        out_shape=jax.ShapeDtypeStruct((n_pad, f), jnp.bfloat16),
        grid=(n_pad // tm, n_pad // tk),
        in_specs=[
            pl.BlockSpec((tm, tk), lambda i, k: (i, k)),   # A tile stream
            xw_spec,                                       # X @ W1 (bf16)
            pl.BlockSpec((tm, 2), lambda i, k: (i, 0)),    # packed [M_low | M_high]
            pl.BlockSpec((f, f), lambda i, k: (0, 0)),     # blockdiag(W2_low, W2_high)
        ],
        out_specs=pl.BlockSpec((tm, f), lambda i, k: (i, 0)),
        scratch_shapes=[pltpu.VMEM((tm, f), jnp.float32)],
        compiler_params=pltpu.CompilerParams(
            dimension_semantics=("parallel", "arbitrary"),
            vmem_limit_bytes=_VMEM_LIMIT),
    )(a, xw_bf, m2, w2_bf)


# ---------------------------------------------------------------------------
# Kernel 3: layer 2 (both branches) + fused skip-combine + output projection.
#   T2 = a_scale * (A @ G) ; [H2_low | H2_high] = relu(T2)
#   Hx = x @ Wx + bx
#   out = relu(T2) @ [a_low*Wo ; a_high*Wo] + Hx @ ((2-a_low-a_high)*Wo) + bo
# ---------------------------------------------------------------------------
def _layer2_kernel(a_ref, g_ref, x_ref, wx_ref, bx_ref, wo2_ref, wox_ref, bo_ref,
                   o_ref, acc_ref, *, tk, rhs_resident, a_scale):
    k = pl.program_id(1)

    @pl.when(k == 0)
    def _():
        acc_ref[...] = jnp.zeros_like(acc_ref)

    a = a_ref[...]
    if a.dtype != jnp.bfloat16:
        a = a.astype(jnp.bfloat16)
    if rhs_resident:
        start = pl.multiple_of(k * tk, tk)
        g = g_ref[pl.ds(start, tk), :]
    else:
        g = g_ref[...]
    acc_ref[...] += jnp.dot(a, g, preferred_element_type=jnp.float32)

    @pl.when(k == pl.num_programs(1) - 1)
    def _():
        t = acc_ref[...]
        if a_scale != 1.0:
            t = t * a_scale
        r = jnp.maximum(t, 0.0).astype(jnp.bfloat16)   # [tm, f] = [H2_low | H2_high]
        hx = jnp.dot(x_ref[...], wx_ref[...],
                     preferred_element_type=jnp.float32) + bx_ref[...]
        out = (jnp.dot(r, wo2_ref[...], preferred_element_type=jnp.float32)
               + jnp.dot(hx.astype(jnp.bfloat16), wox_ref[...],
                         preferred_element_type=jnp.float32)
               + bo_ref[...])
        o_ref[...] = out.astype(o_ref.dtype)


def layer2_combine(a, g_bf, x_bf, wx_bf, bx, wo2_bf, wox_bf, bo, *,
                   tm, tk, a_scale, rhs_resident):
    n_pad = a.shape[0]
    f = g_bf.shape[1]
    d = x_bf.shape[1]
    hid_p = wx_bf.shape[1]
    c = wo2_bf.shape[1]
    kernel = functools.partial(_layer2_kernel, tk=tk,
                               rhs_resident=rhs_resident, a_scale=a_scale)
    g_spec = (pl.BlockSpec((n_pad, f), lambda i, k: (0, 0)) if rhs_resident
              else pl.BlockSpec((tk, f), lambda i, k: (k, 0)))
    return pl.pallas_call(
        kernel,
        out_shape=jax.ShapeDtypeStruct((n_pad, c), jnp.float32),
        grid=(n_pad // tm, n_pad // tk),
        in_specs=[
            pl.BlockSpec((tm, tk), lambda i, k: (i, k)),    # A tile stream
            g_spec,                                         # G (bf16)
            pl.BlockSpec((tm, d), lambda i, k: (i, 0)),     # x rows (skip path, bf16)
            pl.BlockSpec((d, hid_p), lambda i, k: (0, 0)),  # Wx (bf16, resident)
            pl.BlockSpec((1, hid_p), lambda i, k: (0, 0)),  # bx (f32)
            pl.BlockSpec((f, c), lambda i, k: (0, 0)),      # [a_low*Wo ; a_high*Wo] bf16
            pl.BlockSpec((hid_p, c), lambda i, k: (0, 0)),  # (2-a_low-a_high)*Wo bf16
            pl.BlockSpec((1, c), lambda i, k: (0, 0)),      # bo (f32)
        ],
        out_specs=pl.BlockSpec((tm, c), lambda i, k: (i, 0)),
        scratch_shapes=[pltpu.VMEM((tm, f), jnp.float32)],
        compiler_params=pltpu.CompilerParams(
            dimension_semantics=("parallel", "arbitrary"),
            vmem_limit_bytes=_VMEM_LIMIT),
    )(a, g_bf, x_bf, wx_bf, bx, wo2_bf, wox_bf, bo)


# ---------------------------------------------------------------------------
# One-time preparation: pad / pack / cast / quantize everything OUTSIDE the
# forward pass (the O(N^2) adjacency is cast exactly once here, never per call).
# ---------------------------------------------------------------------------
def ncgcn_prepare(params, x, A_norm, M_low, M_high, *, tm=1024, tk=1024,
                  a_dtype=jnp.bfloat16, rhs_resident=None):
    n, d = x.shape
    hid = params["W1_low_t"].shape[1]
    c = params["Wo_t"].shape[1]
    hid_p = _round_up(hid, 64)          # lane-dense: f = 2*hid_p is a multiple of 128
    f = 2 * hid_p

    tm, tk, n_pad = _choose_tiles(n, tm, tk)
    if rhs_resident is None:
        # Full-extent (constant index_map) RHS: budget 2 buffers of (n_pad, f) bf16.
        rhs_resident = (2 * n_pad * f * 2) <= _RHS_RESIDENT_MAX_BYTES

    a_low = float(params["alphas"][0])
    a_high = float(params["alphas"][1])

    # ---- adjacency: pad + cast / quantize exactly once ----
    A_pad = jnp.zeros((n_pad, n_pad), jnp.float32).at[:n, :n].set(A_norm)
    if a_dtype == jnp.int8:                      # v5e / v6e byte-halving path
        amax = float(jnp.max(jnp.abs(A_pad)))
        a_scale = amax / 127.0 if amax > 0.0 else 1.0
        A_prep = jnp.clip(jnp.round(A_pad / a_scale), -127.0, 127.0).astype(jnp.int8)
    else:                                        # bf16 default; jnp.float8_e4m3fn on v7x
        a_scale = 1.0
        A_prep = A_pad.astype(a_dtype)

    # ---- node features / packed masks ----
    x_pad = jnp.zeros((n_pad, d), jnp.float32).at[:n, :].set(x)
    x_bf = x_pad.astype(jnp.bfloat16)
    m2 = jnp.zeros((n_pad, 2), jnp.float32)
    m2 = m2.at[:n, 0].set(M_low).at[:n, 1].set(M_high)

    # ---- weights: pad hid -> hid_p per branch, fold alphas, store bf16 ----
    w1 = jnp.zeros((d, f), jnp.float32)
    w1 = (w1.at[:, :hid].set(params["W1_low_t"])
            .at[:, hid_p:hid_p + hid].set(params["W1_high_t"]))
    w2 = jnp.zeros((f, f), jnp.float32)
    w2 = (w2.at[:hid, :hid].set(params["W2_low_t"])
            .at[hid_p:hid_p + hid, hid_p:hid_p + hid].set(params["W2_high_t"]))
    wx = jnp.zeros((d, hid_p), jnp.float32).at[:, :hid].set(params["Wx_t"])
    bx = jnp.zeros((1, hid_p), jnp.float32).at[:, :hid].set(params["bx"])
    wo2 = jnp.zeros((f, c), jnp.float32)
    wo2 = (wo2.at[:hid, :].set(a_low * params["Wo_t"])
              .at[hid_p:hid_p + hid, :].set(a_high * params["Wo_t"]))
    wox = jnp.zeros((hid_p, c), jnp.float32).at[:hid, :].set(
        (2.0 - a_low - a_high) * params["Wo_t"])
    bo = params["bo"].astype(jnp.float32)

    return dict(
        A=A_prep, x_bf=x_bf, m2=m2,
        w1_bf=w1.astype(jnp.bfloat16), w2_bf=w2.astype(jnp.bfloat16),
        wx_bf=wx.astype(jnp.bfloat16), bx=bx,
        wo2_bf=wo2.astype(jnp.bfloat16), wox_bf=wox.astype(jnp.bfloat16), bo=bo,
        # Static metadata (python scalars) — do not pass this dict through jax.jit.
        meta=dict(n=n, n_pad=n_pad, hid_p=hid_p, f=f, tm=tm, tk=tk,
                  a_scale=a_scale, rhs_resident=bool(rhs_resident)),
    )


# ---------------------------------------------------------------------------
# NCGCN forward (eval mode: dropout = identity). Consumes prepared operands;
# A is streamed exactly twice, never re-cast.
# ---------------------------------------------------------------------------
def ncgcn_forward(prep):
    meta = prep["meta"]
    tm, tk = meta["tm"], meta["tk"]
    xw = project(prep["x_bf"], prep["w1_bf"], tm=tm)            # X @ [W1_low|W1_high]
    g = layer1(prep["A"], xw, prep["m2"], prep["w2_bf"],
               tm=tm, tk=tk, hid_p=meta["hid_p"],
               a_scale=meta["a_scale"], rhs_resident=meta["rhs_resident"])
    out = layer2_combine(prep["A"], g, prep["x_bf"], prep["wx_bf"], prep["bx"],
                         prep["wo2_bf"], prep["wox_bf"], prep["bo"],
                         tm=tm, tk=tk, a_scale=meta["a_scale"],
                         rhs_resident=meta["rhs_resident"])
    return out[:meta["n"]]


# ---------------------------------------------------------------------------
# Pure-JAX, f32, module-faithful reference (eval mode)
# ---------------------------------------------------------------------------
def ncgcn_reference(params, x, A_norm, M_low, M_high):
    dot = functools.partial(jnp.dot, precision=jax.lax.Precision.HIGHEST)
    relu = jax.nn.relu
    H1_low = relu(dot(dot(A_norm * M_low[:, None], x), params["W1_low_t"]))
    H1_high = relu(dot(dot(A_norm * M_high[:, None], x), params["W1_high_t"]))
    H2_low = relu(dot(dot(A_norm * M_low[None, :], H1_low), params["W2_low_t"]))
    H2_high = relu(dot(dot(A_norm * M_high[None, :], H1_high), params["W2_high_t"]))
    Hx = dot(x, params["Wx_t"]) + params["bx"]
    a_low = params["alphas"][0]
    a_high = params["alphas"][1]
    Ho_low = a_low * H2_low + (1.0 - a_low) * Hx
    Ho_high = a_high * H2_high + (1.0 - a_high) * Hx
    return dot(Ho_low + Ho_high, params["Wo_t"]) + params["bo"]


def _rel_err(a, b):
    return float(jnp.linalg.norm(a.astype(jnp.float32) - b)
                 / (jnp.linalg.norm(b) + 1e-30))


if __name__ == "__main__":
    # Small synthetic shapes: N nodes, in_dim feats, hid_dim hidden, C classes.
    N, in_dim, hid_dim, num_classes = 256, 64, 32, 8

    key = jax.random.PRNGKey(0)
    ks = jax.random.split(key, 12)

    def init(k, shape, scale):
        return scale * jax.random.normal(k, shape, jnp.float32)

    params = {
        # nn.Linear(in, out).weight is (out, in); we store its transpose.
        "W1_low_t": init(ks[0], (in_dim, hid_dim), 0.2),
        "W1_high_t": init(ks[1], (in_dim, hid_dim), 0.2),
        "W2_low_t": init(ks[2], (hid_dim, hid_dim), 0.5),
        "W2_high_t": init(ks[3], (hid_dim, hid_dim), 0.5),
        "Wx_t": init(ks[4], (in_dim, hid_dim), 0.1),
        "bx": init(ks[5], (1, hid_dim), 0.1),
        "Wo_t": init(ks[6], (hid_dim, num_classes), 0.2),
        "bo": init(ks[7], (1, num_classes), 0.1),
        # alpha_low = alpha_high = 0.5 (module __init__ defaults).
        "alphas": jnp.array([0.5, 0.5], dtype=jnp.float32),
    }

    x = init(ks[8], (N, in_dim), 1.0)
    # Row-normalized adjacency with self-loops (SELF_LOOP=True in the config).
    A_raw = jax.random.uniform(ks[9], (N, N), jnp.float32)
    A_norm = (0.5 * jnp.eye(N, dtype=jnp.float32)
              + 0.5 * A_raw / jnp.sum(A_raw, axis=1, keepdims=True))
    M_low = (jax.random.uniform(ks[10], (N,)) > 0.5).astype(jnp.float32)
    M_high = 1.0 - M_low

    ref = ncgcn_reference(params, x, A_norm, M_low, M_high)

    # 1) bf16-A stream, VMEM-resident RHS, tm=tk=128 => real (2, 2) grid.
    prep = ncgcn_prepare(params, x, A_norm, M_low, M_high, tm=128, tk=128)
    out = jax.block_until_ready(ncgcn_forward(prep))
    assert out.shape == (N, num_classes)
    e1 = _rel_err(out, ref)
    assert e1 < 2.5e-2, f"bf16/resident path: rel err {e1:.3e}"

    # 2) Same, but streaming the hid-wide RHS per k-tile (very-large-graph fallback).
    prep_s = ncgcn_prepare(params, x, A_norm, M_low, M_high, tm=128, tk=128,
                           rhs_resident=False)
    out_s = jax.block_until_ready(ncgcn_forward(prep_s))
    e2 = _rel_err(out_s, ref)
    assert e2 < 2.5e-2, f"bf16/streamed-RHS path: rel err {e2:.3e}"

    # 3) int8-quantized A stream (v5e/v6e byte-halving path). Checked against the
    #    dequantized adjacency so only kernel (not quantization) error is measured.
    prep_q = ncgcn_prepare(params, x, A_norm, M_low, M_high, tm=128, tk=128,
                           a_dtype=jnp.int8)
    out_q = jax.block_until_ready(ncgcn_forward(prep_q))
    A_deq = prep_q["A"][:N, :N].astype(jnp.float32) * prep_q["meta"]["a_scale"]
    ref_q = ncgcn_reference(params, x, A_deq, M_low, M_high)
    e3 = _rel_err(out_q, ref_q)
    assert e3 < 2.5e-2, f"int8-A path: rel err {e3:.3e}"

    print("KERNEL_OK")
</pallas_src>

<mosaic_0001>
module attributes {stable_mosaic.version = 11 : i64} {
  func.func @_project_kernel(%arg0: i32, %arg1: memref<128x64xbf16, #tpu.memory_space<vmem>>, %arg2: memref<64x128xbf16, #tpu.memory_space<vmem>>, %arg3: memref<128x128xbf16, #tpu.memory_space<vmem>>) attributes {dimension_semantics = [#tpu.dimension_semantics<parallel>], iteration_bounds = array<i64: 2>, scalar_prefetch = 0 : i64, scratch_operands = 0 : i64, tpu.core_type = #tpu.core_type<tc>, window_params = [{transform_indices = @transform_0, window_bounds = array<i64: 128, 64>}, {pipeline_mode = #tpu.pipeline_mode<synchronous>, transform_indices = @transform_1, window_bounds = array<i64: 64, 128>}, {transform_indices = @transform_2, window_bounds = array<i64: 128, 128>}]} {
    %c0 = arith.constant 0 : index
    %c0_0 = arith.constant 0 : index
    %0 = vector.load %arg1[%c0, %c0_0] : memref<128x64xbf16, #tpu.memory_space<vmem>>, vector<128x64xbf16>
    %c0_1 = arith.constant 0 : index
    %c0_2 = arith.constant 0 : index
    %1 = vector.load %arg2[%c0_1, %c0_2] : memref<64x128xbf16, #tpu.memory_space<vmem>>, vector<64x128xbf16>
    %cst = arith.constant dense<0.000000e+00> : vector<128x128xf32>
    %2 = tpu.matmul %0, %1, %cst {dimension_numbers = #tpu.dot_dimension_numbers<[1], [0], [0], [1], [0, 0, 1, 1], [], []>} : vector<128x64xbf16>, vector<64x128xbf16>, vector<128x128xf32> -> vector<128x128xf32>
    %3 = arith.truncf %2 : vector<128x128xf32> to vector<128x128xbf16>
    %c0_3 = arith.constant 0 : index
    %c0_4 = arith.constant 0 : index
    %4 = vector.load %arg3[%c0_3, %c0_4] : memref<128x128xbf16, #tpu.memory_space<vmem>>, vector<128x128xbf16>
    tpu.vector_store %arg3[%c0_3, %c0_4], %3 {strides = array<i32>} : memref<128x128xbf16, #tpu.memory_space<vmem>>, vector<128x128xbf16>,
    return
  }
  func.func @transform_0(%arg0: i32) -> (i32, i32) {
    %c0_i32 = arith.constant 0 : i32
    %c0_i32_0 = arith.constant 0 : i32
    return %arg0, %c0_i32 : i32, i32
  }
  func.func @transform_1(%arg0: i32) -> (i32, i32) {
    %c0_i32 = arith.constant 0 : i32
    %c0_i32_0 = arith.constant 0 : i32
    %c0_i32_1 = arith.constant 0 : i32
    return %c0_i32, %c0_i32_0 : i32, i32
  }
  func.func @transform_2(%arg0: i32) -> (i32, i32) {
    %c0_i32 = arith.constant 0 : i32
    %c0_i32_0 = arith.constant 0 : i32
    return %arg0, %c0_i32 : i32, i32
  }
}

</mosaic_0001>

<bundles_post_ra>
// kernel: tpu_custom_call.1
= control target key start
LH: loop header
LB: loop body
LE: loop exit
PB: predicated region body
PF: predicated region fallthrough
CT: control target
= control target key end

     0   :  { %7 = vsyncpa [#allocation3], 0  ;;  %s1182_s0 = inlined_call_operand.hbm [shape: bf16[256,64], index: 0, kind: input, shape index: {}]   ;;  %s1183_s1 = inlined_call_operand.hbm [shape: bf16[64,128], index: 1, kind: input, shape index: {}]   ;;  %s1184_s2 = inlined_call_operand.hbm [shape: bf16[256,128], index: 2, kind: output, shape index: {}]  }
   0x1   :  { %9 = vsyncpa [#allocation3 + $0x1], 0 }
   0x2   :  { %10 = vsyncpa [#allocation6], 0 }
   0x3   :  { %11 = vsyncpa [#allocation4], 0 }
   0x4   :  { %13 = vsyncpa [#allocation4 + $0x1], 0  ;;  %s953_s9 = smov 0   ;;  %s955_s10 = smov 0  }
   0x5   :  { %s957_s11 = smov 0   ;;  %s959_s12 = smov 0  }
   0x6 LB: > { %s974_s13 = sadd.s32 4294967295, %s929_s12   ;;  %s567_s14 = sadd.s32 4294967294, %s929_s12   ;;  %s929_s12 = sphi %s959_s12, %s1204_s12   ;;  %s925_s11 = sphi %s957_s11, %s1203_s11   ;;  %s921_s10 = sphi %s955_s10, %s1202_s10   ;;  %s917_s9 = sphi %s953_s9, %s1201_s9  }
   0x7   : > { %p39_p0 = scmp.ne.s32.totalorder %s921_s10, %s917_s9  ;;  %p1185_p1 = scmp.eq.s32.totalorder %s974_s13, 0 }
   0x8   : > { %p90_p3 = scmp.eq.s32.totalorder %s567_s14, 1  ;;  %p568_p5 = scmp.ge.s32.totalorder %s929_s12, 1 }
   0x9   : > { %p983_p4 = por %p1185_p1, %p39_p0  ;;  %p97_p7 = scmp.lt.s32.totalorder %s929_s12, 3 }
   0xa   : > { %p988_p6 = por %p90_p3, %p39_p0  ;;  %s931_s18 = smov [#allocation5]  }
   0xb   : > { %s1188_s15 = scalar_select %p983_p4, 1, 0 }
   0xc   : > { %s1189_s16 = scalar_select %p988_p6, 1, 0 }
   0xd   : > { %p993_p8 = pnand %p568_p5, %p97_p7  ;;  %s109_s19 = sshll.u32 %s931_s18, 4  ;;  %s997_s19 = int_to_ptr.vmem [resolvable:$true] %s109_s19 }
   0xe   : > { %s1009_s21 = sadd.s32 1, %s929_s12   ;;  %s26_s22 = sadd.s32 1, %s925_s11 }
   0xf   : > { %s1190_s17 = scalar_select %p993_p8, 1, 0 }
  0x10   : > { %p736_p9 = pneg %p993_p8  ;;  %s23_s23 = ssub.s32 %s929_s12, %s1009_s21 }
  0x11   : > { %s801_s26 = scalar_lea.hbm %s1183_s1, 512 }
  0x12   : > { %p1004_p11 = pnand %p736_p9, %p1185_p1  ;;  %p802_p12 = scmp.ne.s32.totalorder %s1183_s1, %s801_s26 }
  0x13   : > { %p808_p5 = scmp.lt.u32.totalorder %s801_s26, %s1183_s1 }
  0x14   : > { %p803_p13 = pneg %p1004_p11 }
  0x16   : > { %p804_p0 = pnand %p803_p13, %p802_p12 }
  0x18   : > { %p805_p3 = pneg %p804_p0 }
  0x1a   : > { %p810_p7 = pnand %p808_p5, %p805_p3 }
  0x1c   : > { %813 = shalt.err (!%p810_p7)
}
  0x1d   : > { %s814_s3 = scalar_lea.vmem %s997_s19, 512  ;;  %p822_p2 = scmp.lt.s32.totalorder %s997_s19, %s997_s19 }
  0x1e   : > { %p815_p9 = scmp.ne.s32.totalorder %s997_s19, %s814_s3  ;;  %p823_p6 = scmp.lt.s32.totalorder %s814_s3, %s814_s3 }
  0x20   : > { %p817_p10 = pnand %p815_p9, %p803_p13  ;;  %p824_p4 = por %p823_p6, %p822_p2 }
  0x22   : > { %p818_p1 = pneg %p817_p10 }
  0x24   : > { %p825_p8 = pnand %p824_p4, %p818_p1 }
  0x26   : > { %828 = shalt.err (!%p825_p8)
}
  0x27   : > { %s932_s4 = smov 64   ;;  %s933_s5 = smov 4  }
  0x28   : > { %739 = dma.hbm_to_vmem [thread:$0]  (!%p1004_p11), %s1183_s1, 512, %s997_s19, [#allocation6], %s932_s4, %s932_s4, %s933_s5  }
  0x29   : > { %p24_p1 = scmp.eq.s32.totalorder %s23_s23, 0  ;;  %p33_p2 = scmp.ne.s32.totalorder %s925_s11, %s921_s10 }
  0x2a   : > { %p34_p4 = scmp.eq.s32.totalorder %s929_s12, 0  ;;  %p749_p6 = scmp.lt.s32.totalorder %s929_s12, 2 }
  0x2b   : > { %s1043_s8 = scalar_select %p24_p1, %s925_s11, %s26_s22  }
  0x2c   : > { %p35_p8 = por %p34_p4, %p33_p2  ;;  %p1192_p10 = scmp.eq.s32.totalorder %s974_s13, 1 }
  0x2d   : > { %s123_s18 = sand.u32 1, %s925_s11   ;;  %s619_s20 = sshll.u32 %s929_s12, 10 }
  0x2e   : > { %p1047_p12 = por %p1192_p10, %p33_p2  ;;  %s571_s24 = sshll.u32 %s123_s18, 6 }
  0x2f   : > { %s1056_s27 = scalar_lea.hbm %s1182_s0, %s619_s20  ;;  %s127_s19 = scalar_lea.vmem [#allocation2], %s571_s24 }
  0x30   : > { %s134_s22 = sshll.u32 %s127_s19, 4  ;;  %p1058_p11 = pnand %p749_p6, %p35_p8  ;;  %s1062_s22 = int_to_ptr.vmem [resolvable:$true] %s134_s22 }
  0x31   : > { %s1064_s28 = scalar_lea.sflag [#allocation3], %s123_s18  ;;  %s829_s29 = scalar_lea.hbm %s1056_s27, 1024 }
  0x32   : > { %p830_p13 = scmp.ne.s32.totalorder %s1056_s27, %s829_s29  ;;  %p831_p0 = pneg %p1058_p11 }
  0x33   : > { %s834_s6 = scalar_lea.hbm %s1182_s0, 2048  ;;  %p835_p7 = scmp.lt.u32.totalorder %s1056_s27, %s1182_s0 }
  0x34   : > { %p832_p3 = pnand %p831_p0, %p830_p13  ;;  %p836_p9 = scmp.lt.u32.totalorder %s834_s6, %s829_s29 }
  0x35   : > { %p838_p2 = scmp.lt.u32.totalorder %s829_s29, %s1056_s27 }
  0x36   : > { %p833_p5 = pneg %p832_p3  ;;  %p837_p1 = por %p836_p9, %p835_p7 }
  0x38   : > { %p839_p4 = por %p838_p2, %p837_p1 }
  0x3a   : > { %p840_p6 = pnand %p839_p4, %p833_p5 }
  0x3c   : > { %843 = shalt.err (!%p840_p6)
}
  0x3d   : > { %s844_s18 = scalar_lea.vmem %s1062_s22, 1024  ;;  %s934_s24 = smov [#allocation2]  }
  0x3e   : > { %p845_p8 = scmp.ne.s32.totalorder %s1062_s22, %s844_s18  ;;  %s849_s25 = sshll.u32 %s934_s24, 4  ;;  %s850_s25 = int_to_ptr.vmem [resolvable:$false] %s849_s25 }
  0x3f   : > { %s851_s26 = scalar_lea.vmem %s850_s25, 2048  ;;  %p852_p3 = scmp.lt.s32.totalorder %s1062_s22, %s850_s25 }
  0x40   : > { %p847_p10 = pnand %p845_p8, %p831_p0  ;;  %p853_p7 = scmp.lt.s32.totalorder %s851_s26, %s844_s18 }
  0x42   : > { %p848_p13 = pneg %p847_p10  ;;  %p854_p9 = por %p853_p7, %p852_p3 }
  0x44   : > { %p855_p1 = pnand %p854_p9, %p848_p13 }
  0x46   : > { %858 = shalt.err (!%p855_p1)
}
  0x47   : > { %743 = dma.hbm_to_vmem [thread:$0]  (!%p1058_p11), %s1056_s27, 1024, %s1062_s22, %s1064_s28, %s932_s4, %s932_s4, %s933_s5  }
  0x48   : > { %p1195_p0 = scmp.ne.s32.totalorder %s1190_s17, 0 }
  0x49   : > { %s1098_s19 = sand.u32 (!%p1195_p0), 1, %s921_s10   ;;  %p1196_p5 = scmp.ne.s32.totalorder (!%p1195_p0), %s1188_s15, 0 }
  0x4a   : > { %146 = sbr.rel (%p1195_p0) target bundleno = 342 (0x156), region = 28  ;;  %s575_s29 = sshll.u32 (!%p1195_p0), %s1098_s19, 6 }
  0x4b   : > { %s149_s30 = scalar_lea.sflag (!%p1195_p0), [#allocation3], %s1098_s19  ;;  %s1104_s23 = scalar_lea.vmem (!%p1195_p0), [#allocation2], %s575_s29 }
  0x51   : > { %904 = dma.done.wait (%p1196_p5), %s149_s30, 1024  }
  0x52   : > { %906 = vsyncadd (%p1196_p5), %s149_s30, 4294966272  ;;  %p1197_p11 = scmp.eq.s32.totalorder %s974_s13, 0 }
  0x54   : > { %908 = dma.done.wait (%p1197_p11), [#allocation6], 512   ;;  %p1198_p2 = pmov %p1197_p11 }
  0x55   : > { %v789_v0 = vld [vmem:[#allocation5] sm:$0xff]   ;;  %v790_v1 = vld [vmem:[#allocation5 + $0x8] sm:$0xff]   ;;  %v791_v2 = vld [vmem:[#allocation5 + $0x10] sm:$0xff]   ;;  %vm268_vm0 = vcmask 523264   ;;  %s176_s15 = scalar_lea.vmem [#allocation7], %s575_s29  ;;  %s636_s4 = sshll.u32 %s974_s13, 10 }
  0x56   : > { %910 = vsyncadd (%p1198_p2), [#allocation6], 4294966784  ;;  %696 = vmatprep.subr.bf16.mxu0 %v789_v0  ;;  %720 = vmatprep.subr.bf16.mxu1 %v789_v0  ;;  %v793_v3 = vld [vmem:[%s1104_s23] sm:$0xff]   ;;  %v792_v5 = vld [vmem:[#allocation5 + $0x18] sm:$0xff]   ;;  %s484_s17 = sshll.u32 %s176_s15, 4  ;;  %s1138_s22 = scalar_lea.hbm %s1184_s2, %s636_s4  ;;  %s1133_s17 = int_to_ptr.vmem [resolvable:$true] %s484_s17 }
  0x57   : > { %697 = vmatpush3.bf16.msra.mxu0 %v789_v0  ;;  %724 = vmatpush3.bf16.msra.mxu1 %v789_v0  ;;  %v794_v4 = vld [vmem:[%s1104_s23 + $0x20] sm:$0xff]   ;;  %v795_v6 = vld [vmem:[%s1104_s23 + $0x8] sm:$0xff]   ;;  %v797_v8 = vld [vmem:[%s1104_s23 + $0x10] sm:$0xff]   ;;  %s471_s13 = scalar_lea.sflag [#allocation4], %s1098_s19  ;;  %s859_s28 = scalar_lea.vmem %s1133_s17, 1024 }
  0x58   : > { %698 = vmatprep.subr.bf16.mxu0 %v790_v1  ;;  %721 = vmatprep.subr.bf16.mxu1 %v790_v1  ;;  %v796_v7 = vld [vmem:[%s1104_s23 + $0x28] sm:$0xff]   ;;  %v798_v9 = vld [vmem:[%s1104_s23 + $0x30] sm:$0xff]   ;;  %v799_v10 = vld [vmem:[%s1104_s23 + $0x18] sm:$0xff]   ;;  %p860_p4 = scmp.ne.s32.totalorder %s1133_s17, %s859_s28  ;;  %s935_s3 = smov [#allocation7]  }
  0x59   : > { %704 = vmatprep.mubr.msk.bf16.mxu0 %vm268_vm0, %v793_v3  ;;  %712 = vmatprep.mubr.msk.bf16.mxu1 %vm268_vm0, %v794_v4  ;;  %v800_v11 = vld [vmem:[%s1104_s23 + $0x38] sm:$0xff]   ;;  %s863_s6 = sshll.u32 %s935_s3, 4  ;;  %s864_s6 = int_to_ptr.vmem [resolvable:$false] %s863_s6 }
  0x5a   : > { %p861_p6 = pnand %p860_p4, %p1047_p12  ;;  %s865_s7 = scalar_lea.vmem %s864_s6, 2048 }
  0x5b   : > { %699 = vmatpush3.bf16.msra.mxu0 %v790_v1  ;;  %725 = vmatpush3.bf16.msra.mxu1 %v790_v1  ;;  %p866_p10 = scmp.lt.s32.totalorder %s1133_s17, %s864_s6  ;;  %p867_p13 = scmp.lt.s32.totalorder %s865_s7, %s859_s28 }
  0x5c   : > { %700 = vmatprep.subr.bf16.mxu0 %v791_v2  ;;  %722 = vmatprep.subr.bf16.mxu1 %v791_v2  ;;  %p862_p8 = pneg %p861_p6 }
  0x5d   : > { %p868_p3 = por %p867_p13, %p866_p10 }
  0x5f   : > { %701 = vmatpush3.bf16.msra.mxu0 %v791_v2  ;;  %726 = vmatpush3.bf16.msra.mxu1 %v791_v2  ;;  %p869_p7 = pnand %p868_p3, %p862_p8 }
  0x60   : > { %702 = vmatprep.subr.bf16.mxu0 %v792_v5  ;;  %723 = vmatprep.subr.bf16.mxu1 %v792_v5 }
  0x63   : > { %703 = vmatpush3.bf16.msra.mxu0 %v792_v5  ;;  %727 = vmatpush3.bf16.msra.mxu1 %v792_v5 }
  0x66   : > { %705 = vmatmul.mubr.msk.bf16.vlgmr.msra.gmra.mrb[0].mxu0 %vm268_vm0, %v795_v6  ;;  %713 = vmatmul.mubr.msk.bf16.vlgmr.msra.gmra.mrb[0].mxu1 %vm268_vm0, %v796_v7 }
  0x67   : > { %708 = vmatprep.mubr.msk.bf16.mxu0 %vm268_vm0, %v797_v8  ;;  %716 = vmatprep.mubr.msk.bf16.mxu1 %vm268_vm0, %v798_v9 }
  0x6e   : > { %709 = vmatmul.mubr.msk.bf16.gmra.mrb[4].mxu0 %vm268_vm0, %v799_v10  ;;  %717 = vmatmul.mubr.msk.bf16.gmra.mrb[4].mxu1 %vm268_vm0, %v800_v11 }
 0x139   : > { %v706_v12 = vpop.f32.mrb[0].mxu0  ;;  %v714_v13 = vpop.f32.mrb[0].mxu1 }
 0x13a   : > { %v327_v14 = vpop.f32.mrb[1].mxu0  ;;  %v359_v15 = vpop.f32.mrb[1].mxu1 }
 0x13b   : > { %v707_v16 = vpop.f32.mrb[2].mxu0  ;;  %v715_v17 = vpop.f32.mrb[2].mxu1 }
 0x13c   : > { %v645_v18 = vpack.c.bf16 %v707_v16, %v706_v12  ;;  %v665_v19 = vpack.c.bf16 %v715_v17, %v714_v13  ;;  %v330_v20 = vpop.f32.mrb[3].mxu0  ;;  %v362_v21 = vpop.f32.mrb[3].mxu1 }
 0x13d   : > { %v640_v22 = vpack.c.bf16 %v330_v20, %v327_v14  ;;  %v660_v23 = vpack.c.bf16 %v362_v21, %v359_v15 }
 0x13e   : > { %677 = vst [vmem:[%s176_s15 + $0x8] sm:$0xff] %v645_v18   ;;  %681 = vst [vmem:[%s176_s15 + $0x28] sm:$0xff] %v665_v19  }
 0x13f   : > { %641 = vst [vmem:[%s176_s15] sm:$0xff] %v640_v22   ;;  %680 = vst [vmem:[%s176_s15 + $0x20] sm:$0xff] %v660_v23  }
 0x141   : > { %v710_v24 = vpop.f32.mrb[4].mxu0  ;;  %v718_v25 = vpop.f32.mrb[4].mxu1 }
 0x142   : > { %v343_v26 = vpop.f32.mrb[5].mxu0  ;;  %v375_v27 = vpop.f32.mrb[5].mxu1 }
 0x143   : > { %v711_v28 = vpop.f32.mrb[6].mxu0  ;;  %v719_v29 = vpop.f32.mrb[6].mxu1 }
 0x144   : > { %v655_v30 = vpack.c.bf16 %v711_v28, %v710_v24  ;;  %v675_v31 = vpack.c.bf16 %v719_v29, %v718_v25  ;;  %v346_v32 = vpop.f32.mrb[7].mxu0  ;;  %v378_v33 = vpop.f32.mrb[7].mxu1 }
 0x145   : > { %v650_v34 = vpack.c.bf16 %v346_v32, %v343_v26  ;;  %v670_v35 = vpack.c.bf16 %v378_v33, %v375_v27 }
 0x146   : > { %679 = vst [vmem:[%s176_s15 + $0x18] sm:$0xff] %v655_v30   ;;  %683 = vst [vmem:[%s176_s15 + $0x38] sm:$0xff] %v675_v31  }
 0x147   : > { %678 = vst [vmem:[%s176_s15 + $0x10] sm:$0xff] %v650_v34   ;;  %682 = vst [vmem:[%s176_s15 + $0x30] sm:$0xff] %v670_v35  }
 0x148   : > { %872 = shalt.err (!%p869_p7)
}
 0x149   : > { %s873_s20 = scalar_lea.hbm %s1138_s22, 1024  ;;  %s877_s25 = scalar_lea.hbm %s1184_s2, 2048 }
 0x14a   : > { %p874_p9 = scmp.ne.s32.totalorder %s1138_s22, %s873_s20  ;;  %p878_p5 = scmp.lt.u32.totalorder %s1138_s22, %s1184_s2 }
 0x14b   : > { %p879_p11 = scmp.lt.u32.totalorder %s877_s25, %s873_s20  ;;  %p881_p4 = scmp.lt.u32.totalorder %s873_s20, %s1138_s22 }
 0x14c   : > { %p875_p1 = pnand %p874_p9, %p1047_p12 }
 0x14d   : > { %p880_p2 = por %p879_p11, %p878_p5 }
 0x14e   : > { %p876_p0 = pneg %p875_p1 }
 0x14f   : > { %p882_p6 = por %p881_p4, %p880_p2 }
 0x151   : > { %p883_p8 = pnand %p882_p6, %p876_p0 }
 0x153   : > { %886 = shalt.err (!%p883_p8)
}
 0x154   : > { %s936_s30 = smov 64   ;;  %s937_s23 = smov 4  }
 0x155   : > { %734 = dma.vmem_to_hbm [thread:$0]  (%p1047_p12), %s1133_s17, 1024, %s1138_s22, %s471_s13, %s936_s30, %s936_s30, %s937_s23  }
 0x156 PF: > { %s499_s15 = sand.u32 1, %s917_s9   ;;  %p1199_p10 = scmp.ne.s32.totalorder %s1189_s16, 0 }
 0x157   : > { %p1200_p13 = scmp.ge.s32.totalorder %s929_s12, 2  ;;  %s500_s4 = scalar_lea.sflag [#allocation4], %s499_s15 }
 0x159   : > { %p745_p3 = pnand %p1200_p13, %p1199_p10 }
 0x15b   : > { %912 = dma.done.wait (!%p745_p3), %s500_s4, 1024  }
 0x15c   : > { %914 = vsyncadd (!%p745_p3), %s500_s4, 4294966272  ;;  %p16_p7 = scmp.ge.s32.totalorder %s1009_s21, 4   ;;  %s1201_s9 = smov %s921_s10 }
 0x15d   : > { %s1202_s10 = smov %s925_s11  ;;  %s1203_s11 = smov %s1043_s8 }
 0x15e   : > { %s1204_s12 = smov %s1009_s21  ;;  %18 = sbr.rel (!%p16_p7) target bundleno = 6 (0x6), region = 77 }
 0x165   :  { %505 = vsyncpa [#allocation3], 1 }
 0x166   :  { %507 = vsyncpa [#allocation3 + $0x1], 1 }
 0x167   :  { %508 = vsyncpa [#allocation6], 1 }
 0x168   :  { %509 = vsyncpa [#allocation4], 1 }
 0x169   :  { %511 = vsyncpa [#allocation4 + $0x1], 1 }

</bundles_post_ra>
